<compile_context>
chip_gen: v7x
topology: tpu7x:2x2x1
jax: 0.10.0
libtpu: 0.0.40
codegen_flags: <defaults>
</compile_context>

<pallas_src>
import jax
import jax.numpy as jnp
import numpy as np
from jax.experimental import pallas as pl
from jax.experimental.pallas import tpu as pltpu


def _conv_bias_relu_kernel(x_ref, w_ref, b_ref, o_ref):
    """Conv2d (stride=1) + bias + ReLU for the whole (small) batch.

    x_ref: (N, Hpad, Wpad*Cin)   padded NHWC input, each row flattened over (w, cin)
    w_ref: (KH, Wpad*Cin, WCp)   banded im2col weight matrices, one per kh tap row:
                                 w_ref[kh, (w+kw)*Cin+cin, w*Cout+co] = W[kh,kw,cin,co]
    b_ref: (1, WCp)              bias tiled along lanes (co fastest), zero-padded
    o_ref: (N, Hout, WCp)        lane-dense output, o[n, h, w*Cout+co]
    """
    N, Hout, _ = o_ref.shape
    KH = w_ref.shape[0]
    bias_row = b_ref[...]                                 # (1, WCp)

    for n in range(N):                                    # N is tiny & static
        # KH independent (Hout, K)@(K, WCp) MXU matmuls; bias folded into the
        # accumulator init, ReLU fused before the (unmasked, lane-dense) store.
        acc = bias_row                                    # broadcasts to (Hout, WCp)
        for kh in range(KH):
            xs = x_ref[n, kh:kh + Hout, :]                # (Hout, Wpad*Cin) static slice
            acc = acc + jnp.dot(
                xs, w_ref[kh],
                preferred_element_type=jnp.float32,
                precision=jax.lax.Precision.HIGHEST)
        o_ref[n] = jnp.maximum(acc, 0.0).astype(o_ref.dtype)


def conv_module_forward(x_nchw, w_oihw, bias, *, stride=1, padding=1):
    """ConvModule.forward with activate_last=True, normalize=None.

    x_nchw: (N, Cin, H, W)      float32 (PyTorch layout)
    w_oihw: (Cout, Cin, KH, KW) float32 (PyTorch layout)
    bias:   (Cout,)             float32
    returns (N, Cout, Hout, Wout) float32 (PyTorch layout)
    """
    assert stride == 1, "example ConvModule config uses stride=1"
    N, Cin, H, W = x_nchw.shape
    Cout, Cin_w, KH, KW = w_oihw.shape
    assert Cin_w == Cin, "groups != 1 not supported"

    Hp, Wp = H + 2 * padding, W + 2 * padding
    Hout, Wout = Hp - KH + 1, Wp - KW + 1
    K = Wp * Cin                                   # contraction length per kh tap row
    WC = Wout * Cout
    WCp = ((WC + 127) // 128) * 128                # keep output stores lane-dense

    # --- input: NCHW -> padded NHWC with (w, cin) flattened. 3 tiny XLA ops. ---
    x = jnp.transpose(x_nchw, (0, 2, 3, 1))
    x = jnp.pad(x, ((0, 0), (padding, padding), (padding, padding), (0, 0)))
    x = x.reshape(N, Hp, K).astype(jnp.float32)

    # --- weights: banded im2col matrix, one (K, WCp) band per kh.
    # w_mat[kh, (w+kw)*Cin+cin, w*Cout+co] = W[kh, kw, cin, co]; zeros elsewhere.
    w_hwio = jnp.transpose(w_oihw, (2, 3, 1, 0)).astype(jnp.float32)  # (KH,KW,Cin,Cout)
    kw_g, cin_g, w_g, co_g = np.meshgrid(
        np.arange(KW), np.arange(Cin), np.arange(Wout), np.arange(Cout),
        indexing="ij")
    rows = (w_g + kw_g) * Cin + cin_g              # (KW, Cin, Wout, Cout)
    cols = w_g * Cout + co_g
    w_mat = jnp.zeros((KH, K, WCp), jnp.float32)
    w_mat = w_mat.at[:, rows, cols].set(w_hwio[:, kw_g, cin_g, co_g])

    b_row = jnp.zeros((1, WCp), jnp.float32).at[0, :WC].set(
        jnp.tile(bias.astype(jnp.float32), Wout))

    # --- pallas call: single invocation, everything resident in VMEM. -------
    out = pl.pallas_call(
        _conv_bias_relu_kernel,
        out_shape=jax.ShapeDtypeStruct((N, Hout, WCp), jnp.float32),
        grid=(1,),
        in_specs=[
            pl.BlockSpec((N, Hp, K), lambda i: (0, 0, 0)),
            pl.BlockSpec((KH, K, WCp), lambda i: (0, 0, 0)),
            pl.BlockSpec((1, WCp), lambda i: (0, 0)),
        ],
        out_specs=pl.BlockSpec((N, Hout, WCp), lambda i: (0, 0, 0)),
        compiler_params=pltpu.CompilerParams(
            dimension_semantics=("arbitrary",)),
    )(x, w_mat, b_row)

    # Undo lane packing; keep NCHW for parity with the PyTorch module.
    # (If the consumer is NHWC/lane-dense, skip this transpose.)
    out = out[..., :WC].reshape(N, Hout, Wout, Cout)
    return jnp.transpose(out, (0, 3, 1, 2))


if __name__ == "__main__":
    key = jax.random.PRNGKey(0)
    kx, kw, kb = jax.random.split(key, 3)

    # ConvModule(in_channels=4, out_channels=8, kernel_size=3, padding=1,
    #            bias=True, normalize=None, activation='relu')
    N, Cin, H, W = 2, 4, 16, 16
    Cout, KH, KW = 8, 3, 3

    x = jax.random.normal(kx, (N, Cin, H, W), dtype=jnp.float32)

    # Deterministic kaiming-style init (relu gain, fan_in = Cin*KH*KW).
    fan_in = Cin * KH * KW
    std = float(np.sqrt(2.0 / fan_in))
    w = jax.random.normal(kw, (Cout, Cin, KH, KW), dtype=jnp.float32) * std
    b = jax.random.normal(kb, (Cout,), dtype=jnp.float32) * 0.01

    y = conv_module_forward(x, w, b, stride=1, padding=1)
    y = jax.block_until_ready(y)

    # Reference: relu(conv2d(x) + b) via lax.conv_general_dilated (NCHW).
    y_ref = jax.lax.conv_general_dilated(
        x, w, window_strides=(1, 1), padding=((1, 1), (1, 1)),
        dimension_numbers=("NCHW", "OIHW", "NCHW"),
        precision=jax.lax.Precision.HIGHEST,
    ) + b.reshape(1, Cout, 1, 1)
    y_ref = jnp.maximum(y_ref, 0.0)

    assert y.shape == (N, Cout, H, W), y.shape
    np.testing.assert_allclose(np.asarray(y), np.asarray(y_ref),
                               rtol=1e-3, atol=1e-3)
    print("KERNEL_OK")
</pallas_src>

<mosaic_0001>
module attributes {stable_mosaic.version = 11 : i64} {
  func.func @_conv_bias_relu_kernel(%arg0: i32, %arg1: memref<2x18x72xf32, #tpu.memory_space<vmem>>, %arg2: memref<3x72x128xf32, #tpu.memory_space<vmem>>, %arg3: memref<1x128xf32, #tpu.memory_space<vmem>>, %arg4: memref<2x16x128xf32, #tpu.memory_space<vmem>>) attributes {dimension_semantics = [#tpu.dimension_semantics<arbitrary>], iteration_bounds = array<i64: 1>, scalar_prefetch = 0 : i64, scratch_operands = 0 : i64, tpu.core_type = #tpu.core_type<tc>, window_params = [{pipeline_mode = #tpu.pipeline_mode<synchronous>, transform_indices = @transform_0, window_bounds = array<i64: 2, 18, 72>}, {pipeline_mode = #tpu.pipeline_mode<synchronous>, transform_indices = @transform_1, window_bounds = array<i64: 3, 72, 128>}, {pipeline_mode = #tpu.pipeline_mode<synchronous>, transform_indices = @transform_2, window_bounds = array<i64: 1, 128>}, {pipeline_mode = #tpu.pipeline_mode<synchronous>, transform_indices = @transform_3, window_bounds = array<i64: 2, 16, 128>}]} {
    %c0 = arith.constant 0 : index
    %c0_0 = arith.constant 0 : index
    %0 = vector.load %arg3[%c0, %c0_0] : memref<1x128xf32, #tpu.memory_space<vmem>>, vector<1x128xf32>
    %c0_1 = arith.constant 0 : index
    %c0_2 = arith.constant 0 : index
    %c0_3 = arith.constant 0 : index
    %1 = vector.load %arg1[%c0_1, %c0_2, %c0_3] : memref<2x18x72xf32, #tpu.memory_space<vmem>>, vector<1x16x72xf32>
    %2 = vector.shape_cast %1 : vector<1x16x72xf32> to vector<16x72xf32>
    %c0_4 = arith.constant 0 : index
    %c0_5 = arith.constant 0 : index
    %c0_6 = arith.constant 0 : index
    %3 = vector.load %arg2[%c0_4, %c0_5, %c0_6] : memref<3x72x128xf32, #tpu.memory_space<vmem>>, vector<1x72x128xf32>
    %4 = vector.shape_cast %3 : vector<1x72x128xf32> to vector<72x128xf32>
    %cst = arith.constant dense<0.000000e+00> : vector<16x128xf32>
    %5 = tpu.matmul %2, %4, %cst {dimension_numbers = #tpu.dot_dimension_numbers<[1], [0], [0], [1], [0, 0, 1, 1], [], []>, precision = #tpu.contract_precision<fp32>} : vector<16x72xf32>, vector<72x128xf32>, vector<16x128xf32> -> vector<16x128xf32>
    %6 = vector.broadcast %0 : vector<1x128xf32> to vector<16x128xf32>
    %7 = arith.addf %6, %5 : vector<16x128xf32>
    %c0_7 = arith.constant 0 : index
    %c1 = arith.constant 1 : index
    %c0_8 = arith.constant 0 : index
    %8 = vector.load %arg1[%c0_7, %c1, %c0_8] : memref<2x18x72xf32, #tpu.memory_space<vmem>>, vector<1x16x72xf32>
    %9 = vector.shape_cast %8 : vector<1x16x72xf32> to vector<16x72xf32>
    %c1_9 = arith.constant 1 : index
    %c0_10 = arith.constant 0 : index
    %c0_11 = arith.constant 0 : index
    %10 = vector.load %arg2[%c1_9, %c0_10, %c0_11] : memref<3x72x128xf32, #tpu.memory_space<vmem>>, vector<1x72x128xf32>
    %11 = vector.shape_cast %10 : vector<1x72x128xf32> to vector<72x128xf32>
    %cst_12 = arith.constant dense<0.000000e+00> : vector<16x128xf32>
    %12 = tpu.matmul %9, %11, %cst_12 {dimension_numbers = #tpu.dot_dimension_numbers<[1], [0], [0], [1], [0, 0, 1, 1], [], []>, precision = #tpu.contract_precision<fp32>} : vector<16x72xf32>, vector<72x128xf32>, vector<16x128xf32> -> vector<16x128xf32>
    %13 = arith.addf %7, %12 : vector<16x128xf32>
    %c0_13 = arith.constant 0 : index
    %c2 = arith.constant 2 : index
    %c0_14 = arith.constant 0 : index
    %14 = vector.load %arg1[%c0_13, %c2, %c0_14] : memref<2x18x72xf32, #tpu.memory_space<vmem>>, vector<1x16x72xf32>
    %15 = vector.shape_cast %14 : vector<1x16x72xf32> to vector<16x72xf32>
    %c2_15 = arith.constant 2 : index
    %c0_16 = arith.constant 0 : index
    %c0_17 = arith.constant 0 : index
    %16 = vector.load %arg2[%c2_15, %c0_16, %c0_17] : memref<3x72x128xf32, #tpu.memory_space<vmem>>, vector<1x72x128xf32>
    %17 = vector.shape_cast %16 : vector<1x72x128xf32> to vector<72x128xf32>
    %cst_18 = arith.constant dense<0.000000e+00> : vector<16x128xf32>
    %18 = tpu.matmul %15, %17, %cst_18 {dimension_numbers = #tpu.dot_dimension_numbers<[1], [0], [0], [1], [0, 0, 1, 1], [], []>, precision = #tpu.contract_precision<fp32>} : vector<16x72xf32>, vector<72x128xf32>, vector<16x128xf32> -> vector<16x128xf32>
    %19 = arith.addf %13, %18 : vector<16x128xf32>
    %cst_19 = arith.constant 0.000000e+00 : f32
    %20 = vector.broadcast %cst_19 : f32 to vector<16x128xf32>
    %21 = arith.maximumf %19, %20 : vector<16x128xf32>
    %c0_20 = arith.constant 0 : index
    %c0_21 = arith.constant 0 : index
    %c0_22 = arith.constant 0 : index
    %22 = vector.load %arg4[%c0_20, %c0_21, %c0_22] : memref<2x16x128xf32, #tpu.memory_space<vmem>>, vector<1x16x128xf32>
    %23 = vector.shape_cast %22 : vector<1x16x128xf32> to vector<16x128xf32>
    %24 = vector.shape_cast %21 : vector<16x128xf32> to vector<1x16x128xf32>
    tpu.vector_store %arg4[%c0_20, %c0_21, %c0_22], %24 {strides = array<i32>} : memref<2x16x128xf32, #tpu.memory_space<vmem>>, vector<1x16x128xf32>,
    %c1_23 = arith.constant 1 : index
    %c0_24 = arith.constant 0 : index
    %c0_25 = arith.constant 0 : index
    %25 = vector.load %arg1[%c1_23, %c0_24, %c0_25] : memref<2x18x72xf32, #tpu.memory_space<vmem>>, vector<1x16x72xf32>
    %26 = vector.shape_cast %25 : vector<1x16x72xf32> to vector<16x72xf32>
    %c0_26 = arith.constant 0 : index
    %c0_27 = arith.constant 0 : index
    %c0_28 = arith.constant 0 : index
    %27 = vector.load %arg2[%c0_26, %c0_27, %c0_28] : memref<3x72x128xf32, #tpu.memory_space<vmem>>, vector<1x72x128xf32>
    %28 = vector.shape_cast %27 : vector<1x72x128xf32> to vector<72x128xf32>
    %cst_29 = arith.constant dense<0.000000e+00> : vector<16x128xf32>
    %29 = tpu.matmul %26, %28, %cst_29 {dimension_numbers = #tpu.dot_dimension_numbers<[1], [0], [0], [1], [0, 0, 1, 1], [], []>, precision = #tpu.contract_precision<fp32>} : vector<16x72xf32>, vector<72x128xf32>, vector<16x128xf32> -> vector<16x128xf32>
    %30 = vector.broadcast %0 : vector<1x128xf32> to vector<16x128xf32>
    %31 = arith.addf %30, %29 : vector<16x128xf32>
    %c1_30 = arith.constant 1 : index
    %c1_31 = arith.constant 1 : index
    %c0_32 = arith.constant 0 : index
    %32 = vector.load %arg1[%c1_30, %c1_31, %c0_32] : memref<2x18x72xf32, #tpu.memory_space<vmem>>, vector<1x16x72xf32>
    %33 = vector.shape_cast %32 : vector<1x16x72xf32> to vector<16x72xf32>
    %c1_33 = arith.constant 1 : index
    %c0_34 = arith.constant 0 : index
    %c0_35 = arith.constant 0 : index
    %34 = vector.load %arg2[%c1_33, %c0_34, %c0_35] : memref<3x72x128xf32, #tpu.memory_space<vmem>>, vector<1x72x128xf32>
    %35 = vector.shape_cast %34 : vector<1x72x128xf32> to vector<72x128xf32>
    %cst_36 = arith.constant dense<0.000000e+00> : vector<16x128xf32>
    %36 = tpu.matmul %33, %35, %cst_36 {dimension_numbers = #tpu.dot_dimension_numbers<[1], [0], [0], [1], [0, 0, 1, 1], [], []>, precision = #tpu.contract_precision<fp32>} : vector<16x72xf32>, vector<72x128xf32>, vector<16x128xf32> -> vector<16x128xf32>
    %37 = arith.addf %31, %36 : vector<16x128xf32>
    %c1_37 = arith.constant 1 : index
    %c2_38 = arith.constant 2 : index
    %c0_39 = arith.constant 0 : index
    %38 = vector.load %arg1[%c1_37, %c2_38, %c0_39] : memref<2x18x72xf32, #tpu.memory_space<vmem>>, vector<1x16x72xf32>
    %39 = vector.shape_cast %38 : vector<1x16x72xf32> to vector<16x72xf32>
    %c2_40 = arith.constant 2 : index
    %c0_41 = arith.constant 0 : index
    %c0_42 = arith.constant 0 : index
    %40 = vector.load %arg2[%c2_40, %c0_41, %c0_42] : memref<3x72x128xf32, #tpu.memory_space<vmem>>, vector<1x72x128xf32>
    %41 = vector.shape_cast %40 : vector<1x72x128xf32> to vector<72x128xf32>
    %cst_43 = arith.constant dense<0.000000e+00> : vector<16x128xf32>
    %42 = tpu.matmul %39, %41, %cst_43 {dimension_numbers = #tpu.dot_dimension_numbers<[1], [0], [0], [1], [0, 0, 1, 1], [], []>, precision = #tpu.contract_precision<fp32>} : vector<16x72xf32>, vector<72x128xf32>, vector<16x128xf32> -> vector<16x128xf32>
    %43 = arith.addf %37, %42 : vector<16x128xf32>
    %cst_44 = arith.constant 0.000000e+00 : f32
    %44 = vector.broadcast %cst_44 : f32 to vector<16x128xf32>
    %45 = arith.maximumf %43, %44 : vector<16x128xf32>
    %c1_45 = arith.constant 1 : index
    %c0_46 = arith.constant 0 : index
    %c0_47 = arith.constant 0 : index
    %46 = vector.load %arg4[%c1_45, %c0_46, %c0_47] : memref<2x16x128xf32, #tpu.memory_space<vmem>>, vector<1x16x128xf32>
    %47 = vector.shape_cast %46 : vector<1x16x128xf32> to vector<16x128xf32>
    %48 = vector.shape_cast %45 : vector<16x128xf32> to vector<1x16x128xf32>
    tpu.vector_store %arg4[%c1_45, %c0_46, %c0_47], %48 {strides = array<i32>} : memref<2x16x128xf32, #tpu.memory_space<vmem>>, vector<1x16x128xf32>,
    return
  }
  func.func @transform_0(%arg0: i32) -> (i32, i32, i32) {
    %c0_i32 = arith.constant 0 : i32
    %c0_i32_0 = arith.constant 0 : i32
    %c0_i32_1 = arith.constant 0 : i32
    %c0_i32_2 = arith.constant 0 : i32
    return %c0_i32, %c0_i32_0, %c0_i32_1 : i32, i32, i32
  }
  func.func @transform_1(%arg0: i32) -> (i32, i32, i32) {
    %c0_i32 = arith.constant 0 : i32
    %c0_i32_0 = arith.constant 0 : i32
    %c0_i32_1 = arith.constant 0 : i32
    %c0_i32_2 = arith.constant 0 : i32
    return %c0_i32, %c0_i32_0, %c0_i32_1 : i32, i32, i32
  }
  func.func @transform_2(%arg0: i32) -> (i32, i32) {
    %c0_i32 = arith.constant 0 : i32
    %c0_i32_0 = arith.constant 0 : i32
    %c0_i32_1 = arith.constant 0 : i32
    return %c0_i32, %c0_i32_0 : i32, i32
  }
  func.func @transform_3(%arg0: i32) -> (i32, i32, i32) {
    %c0_i32 = arith.constant 0 : i32
    %c0_i32_0 = arith.constant 0 : i32
    %c0_i32_1 = arith.constant 0 : i32
    %c0_i32_2 = arith.constant 0 : i32
    return %c0_i32, %c0_i32_0, %c0_i32_1 : i32, i32, i32
  }
}

</mosaic_0001>

<bundles_post_ra>
// kernel: tpu_custom_call.1
= control target key start
LH: loop header
LB: loop body
LE: loop exit
PB: predicated region body
PF: predicated region fallthrough
CT: control target
= control target key end

     0   :  { %8 = vsyncpa [#allocation3], 0  ;;  %s6364_s0 = inlined_call_operand.vmem [shape: f32[2,18,72], index: 0, kind: input, shape index: {}]   ;;  %s6365_s1 = inlined_call_operand.hbm [shape: f32[3,72,128], index: 1, kind: input, shape index: {}]   ;;  %s6366_s2 = inlined_call_operand.vmem [shape: f32[1,128], index: 2, kind: input, shape index: {}]   ;;  %s6367_s3 = inlined_call_operand.hbm [shape: f32[2,16,128], index: 3, kind: output, shape index: {}]  }
   0x1   :  { %9 = vsyncpa [#allocation4], 0  ;;  %s5597_s12 = smov [#allocation2]   ;;  %s5549_s16 = scalar_lea.hbm %s6365_s1, 3456 }
   0x2   :  { %s17_s13 = sshll.u32 %s5597_s12, 4  ;;  %p5550_p0 = scmp.ne.s32.totalorder %s6365_s1, %s5549_s16  ;;  %s18_s13 = int_to_ptr.vmem [resolvable:$true] %s17_s13 }
   0x3   :  { %p5553_p1 = scmp.lt.u32.totalorder %s5549_s16, %s6365_s1 }
   0x5   :  { %p5555_p2 = pnand %p5553_p1, %p5550_p0 }
   0x7   :  { %5558 = shalt.err (!%p5555_p2)
}
   0x8   :  { %s5559_s21 = scalar_lea.vmem %s18_s13, 3456  ;;  %p5564_p4 = scmp.lt.s32.totalorder %s18_s13, %s18_s13 }
   0x9   :  { %p5560_p3 = scmp.ne.s32.totalorder %s18_s13, %s5559_s21  ;;  %p5565_p5 = scmp.lt.s32.totalorder %s5559_s21, %s5559_s21 }
   0xb   :  { %p5566_p6 = por %p5565_p5, %p5564_p4 }
   0xd   :  { %p5567_p7 = pnand %p5566_p6, %p5560_p3 }
   0xf   :  { %5570 = shalt.err (!%p5567_p7)
}
  0x10   :  { %s5598_s22 = smov 128   ;;  %s5599_s23 = smov 8  }
  0x11   :  { %23 = dma.hbm_to_vmem [thread:$0]  %s6365_s1, 3456, %s18_s13, [#allocation3], %s5598_s22, %s5598_s22, %s5599_s23  }
  0x12   :  { %5593 = dma.done.wait [#allocation3], 3456  }
  0x13   :  { %5594 = vsyncadd [#allocation3], 4294963840  ;;  %v32_v0 = vld [vmem:[#allocation2] sm:$0xff]  ;;  %v33_v1 = vld [vmem:[#allocation2 + $0x8] sm:$0xff]  ;;  %vm41_vm0 = vcmask 588800   ;;  %s5600_s25 = smov [#allocation5]  }
  0x14   :  { %v34_v2 = vld [vmem:[#allocation2 + $0x10] sm:$0xff]  ;;  %v49_v3 = vand.u32 4294901760, %v32_v0  ;;  %v52_v4 = vand.u32 4294901760, %v33_v1  ;;  %v35_v5 = vld [vmem:[#allocation2 + $0x18] sm:$0xff]  ;;  %v36_v7 = vld [vmem:[#allocation2 + $0x20] sm:$0xff]  ;;  %s3726_s1 = sshll.u32 %s5600_s25, 4  ;;  %s3727_s1 = int_to_ptr.vmem [resolvable:$true] %s3726_s1 }
  0x15   :  { %v55_v6 = vand.u32 4294901760, %v34_v2  ;;  %v5636_v8 = vld [vmem:[#allocation2 + $0x28] sm:$0xff]  ;;  %v58_v9 = vand.u32 4294901760, %v35_v5  ;;  %v61_v10 = vand.u32 4294901760, %v36_v7  ;;  %v5639_v12 = vld [vmem:[#allocation2 + $0x30] sm:$0xff]  ;;  %v5641_v13 = vld [vmem:[#allocation2 + $0x38] sm:$0xff]  ;;  %p5576_p9 = scmp.lt.s32.totalorder %s3727_s1, %s3727_s1 }
  0x16   :  { %v64_v11 = vand.u32 4294901760, %v5636_v8  ;;  %v5643_v14 = vpack.c.bf16 %v52_v4, %v49_v3  ;;  %v67_v15 = vand.u32 4294901760, %v5639_v12  ;;  %v30_v16 = vld [vmem:[%s6364_s0] sm:$0xff]  ;;  %v3739_v17 = vld [vmem:[%s6364_s0 + $0x18] sm:$0xff]  ;;  %v31_v18 = vld [vmem:[%s6364_s0 + $0x8] sm:$0xff]  ;;  %v70_v20 = vand.u32 4294901760, %v5641_v13 }
  0x17   :  { %v5655_v19 = vpack.c.bf16 %v58_v9, %v55_v6  ;;  %v43_v21 = vsel %vm41_vm0, %v30_v16, 0  ;;  %v5659_v22 = vsub.f32 %v32_v0, %v49_v3  ;;  %v3740_v23 = vld [vmem:[%s6364_s0 + $0x20] sm:$0xff]  ;;  %v5672_v26 = vsub.f32 %v33_v1, %v52_v4  ;;  %v40_v46 = vld [vmem:[#allocation2 + $0x40] sm:$0xff] }
  0x18   :  { %4898 = vmatprep.subr.bf16.mxu0 %v5643_v14  ;;  %5186 = vmatprep.subr.bf16.mxu1 %v5643_v14  ;;  %v5668_v24 = vpack.c.bf16 %v64_v11, %v61_v10  ;;  %v5670_v25 = vand.u32 4294901760, %v43_v21  ;;  %v1892_v27 = vsel %vm41_vm0, %v3739_v17, 0  ;;  %v46_v30 = vsel %vm41_vm0, %v31_v18, 0 }
  0x19   :  { %4900 = vmatpush3.bf16.msra.mxu0 %v5643_v14  ;;  %5188 = vmatpush3.bf16.msra.mxu1 %v5643_v14  ;;  %v145_v28 = vand.u32 4294901760, %v5659_v22  ;;  %v5678_v29 = vand.u32 4294901760, %v1892_v27  ;;  %v1895_v31 = vsel %vm41_vm0, %v3740_v23, 0  ;;  %v152_v33 = vand.u32 4294901760, %v5672_v26 }
  0x1a   :  { %4902 = vmatprep.subr.bf16.mxu0 %v5655_v19  ;;  %5190 = vmatprep.subr.bf16.mxu1 %v5655_v19  ;;  %v5685_v32 = vsub.f32 %v43_v21, %v5670_v25  ;;  %v5688_v34 = vand.u32 4294901760, %v46_v30  ;;  %v5690_v35 = vand.u32 4294901760, %v1895_v31  ;;  %v5695_v37 = vsub.f32 %v34_v2, %v55_v6 }
  0x1b   :  { %v5693_v36 = vsub.f32 %v1892_v27, %v5678_v29  ;;  %v5697_v38 = vsub.f32 %v35_v5, %v58_v9  ;;  %v5708_v42 = vpack.c.bf16 %v70_v20, %v67_v15  ;;  %v146_v48 = vsub.f32 %v5659_v22, %v145_v28 }
  0x1c   :  { %v124_v39 = vand.u32 4294901760, %v5685_v32  ;;  %v5701_v40 = vsub.f32 %v46_v30, %v5688_v34  ;;  %v5704_v41 = vsub.f32 %v1895_v31, %v5690_v35  ;;  %v159_v44 = vand.u32 4294901760, %v5695_v37 }
  0x1d   :  { %4904 = vmatpush3.bf16.msra.mxu0 %v5655_v19  ;;  %5192 = vmatpush3.bf16.msra.mxu1 %v5655_v19  ;;  %v1973_v43 = vand.u32 4294901760, %v5693_v36  ;;  %v166_v45 = vand.u32 4294901760, %v5697_v38  ;;  %v153_v49 = vsub.f32 %v5672_v26, %v152_v33  ;;  %v5729_v53 = vsub.f32 %v36_v7, %v61_v10 }
  0x1e   :  { %4906 = vmatprep.subr.bf16.mxu0 %v5668_v24  ;;  %5194 = vmatprep.subr.bf16.mxu1 %v5668_v24  ;;  %v125_v47 = vsub.f32 %v5685_v32, %v124_v39  ;;  %v134_v51 = vand.u32 4294901760, %v5701_v40  ;;  %v1983_v52 = vand.u32 4294901760, %v5704_v41  ;;  %v160_v55 = vsub.f32 %v5695_v37, %v159_v44 }
  0x1f   :  { %v1974_v50 = vsub.f32 %v5693_v36, %v1973_v43  ;;  %v167_v56 = vsub.f32 %v5697_v38, %v166_v45  ;;  %v5739_v57 = vand.u32 4294901760, %v40_v46  ;;  %v173_v59 = vand.u32 4294901760, %v5729_v53 }
  0x20   :  { %v126_v54 = vand.u32 4294901760, %v125_v47  ;;  %v147_v60 = vand.u32 4294901760, %v146_v48  ;;  %v154_v61 = vand.u32 4294901760, %v153_v49  ;;  %v5747_v62 = vsub.f32 %v5636_v8, %v64_v11 }
  0x21   :  { %4908 = vmatpush3.bf16.msra.mxu0 %v5668_v24  ;;  %5196 = vmatpush3.bf16.msra.mxu1 %v5668_v24  ;;  %v1975_v58 = vand.u32 4294901760, %v1974_v50  ;;  %v5750_v63 = vsub.f32 %v5639_v12, %v67_v15  ;;  %v135_v0 = vsub.f32 %v5701_v40, %v134_v51  ;;  %v1984_v1 = vsub.f32 %v5704_v41, %v1983_v52 }
  0x22   :  { %4910 = vmatprep.subr.bf16.mxu0 %v5708_v42  ;;  %5198 = vmatprep.subr.bf16.mxu1 %v5708_v42  ;;  %v5759_v2 = vsub.f32 %v5641_v13, %v70_v20  ;;  %v161_v3 = vand.u32 4294901760, %v160_v55  ;;  %v168_v4 = vand.u32 4294901760, %v167_v56  ;;  %v180_v5 = vand.u32 4294901760, %v5747_v62 }
  0x23   :  { %4159 = vmatprep.mubr.f32.mxu0 %v126_v54  ;;  %4537 = vmatprep.mubr.f32.mxu1 %v1975_v58  ;;  %v174_v6 = vsub.f32 %v5729_v53, %v173_v59  ;;  %v187_v7 = vand.u32 4294901760, %v5750_v63  ;;  %v4913_v9 = vpack.c.bf16 %v154_v61, %v147_v60  ;;  %v136_v11 = vand.u32 4294901760, %v135_v0  ;;  %v656_v58 = vld [vmem:[#allocation2 + $0x68] sm:$0xff]  ;;  %v657_v60 = vld [vmem:[#allocation2 + $0x70] sm:$0xff] }
  0x24   :  { %v194_v8 = vand.u32 4294901760, %v5759_v2  ;;  %v181_v10 = vsub.f32 %v5747_v62, %v180_v5  ;;  %v1985_v12 = vand.u32 4294901760, %v1984_v1  ;;  %v4917_v13 = vpack.c.bf16 %v168_v4, %v161_v3  ;;  %v658_v3 = vld [vmem:[#allocation2 + $0x78] sm:$0xff] }
  0x25   :  { %4912 = vmatpush3.bf16.msra.mxu0 %v5708_v42  ;;  %5200 = vmatpush3.bf16.msra.mxu1 %v5708_v42  ;;  %v5775_v15 = vsub.f32 %v40_v46, %v5739_v57  ;;  %v175_v16 = vand.u32 4294901760, %v174_v6  ;;  %v188_v18 = vsub.f32 %v5750_v63, %v187_v7  ;;  %v4929_v48 = vpack.c.bf16 %v5672_v26, %v5659_v22  ;;  %v659_v6 = vld [vmem:[#allocation2 + $0x80] sm:$0xff] }
  0x26   :  { %4157 = vmatprep.subr.mxu0 %v5739_v57  ;;  %4535 = vmatprep.subr.mxu1 %v5739_v57  ;;  %v182_v17 = vand.u32 4294901760, %v181_v10  ;;  %v195_v20 = vsub.f32 %v5759_v2, %v194_v8  ;;  %v4933_v49 = vpack.c.bf16 %v5697_v38, %v5695_v37  ;;  %v4937_v50 = vpack.c.bf16 %v5747_v62, %v5729_v53  ;;  %v650_v53 = vld [vmem:[%s6364_s0 + $0x9] sm:$0xff] }
  0x27   :  { %v189_v23 = vand.u32 4294901760, %v188_v18  ;;  %v5786_v30 = vand.u32 4294901760, %v5775_v15  ;;  %v4941_v54 = vpack.c.bf16 %v5759_v2, %v5750_v63  ;;  %v4969_v22 = vpack.c.bf16 %v180_v5, %v173_v59 }
  0x28   :  { %v4921_v21 = vpack.c.bf16 %v182_v17, %v175_v16  ;;  %v196_v27 = vand.u32 4294901760, %v195_v20  ;;  %v4973_v26 = vpack.c.bf16 %v194_v8, %v187_v7  ;;  %v680_v0 = vand.u32 4294901760, %v656_v58 }
  0x29   :  { %4158 = vmatpush3.msra.mxu0 %v5739_v57  ;;  %4536 = vmatpush3.msra.mxu1 %v5739_v57  ;;  %v202_v46 = vsub.f32 %v5775_v15, %v5786_v30  ;;  %v683_v2 = vand.u32 4294901760, %v657_v60 }
  0x2a   :  { %4914 = vmatprep.subr.bf16.mxu0 %v4913_v9  ;;  %5202 = vmatprep.subr.bf16.mxu1 %v4913_v9  ;;  %v4925_v31 = vpack.c.bf16 %v196_v27, %v189_v23 }
  0x2b   :  { %4160 = vmatmul.mubr.f32.vlgmr.msra.gmra.mrb[0].mxu0 %v136_v11  ;;  %4538 = vmatmul.mubr.f32.vlgmr.msra.gmra.mrb[0].mxu1 %v1985_v12  ;;  %v203_v47 = vand.u32 4294901760, %v202_v46  ;;  %v686_v12 = vand.u32 4294901760, %v658_v3  ;;  %v5958_v23 = vsub.f32 %v657_v60, %v683_v2  ;;  %v660_v46 = vld [vmem:[#allocation2 + $0x88] sm:$0xff] }
  0x2c   :  { %4916 = vmatpush3.bf16.msra.mxu0 %v4913_v9  ;;  %5204 = vmatpush3.bf16.msra.mxu1 %v4913_v9 }
  0x2d   :  { %4918 = vmatprep.subr.bf16.mxu0 %v4917_v13  ;;  %5206 = vmatprep.subr.bf16.mxu1 %v4917_v13 }
  0x2e   :  { %4180 = vmatprep.mubr.f32.mxu0 %v5670_v25  ;;  %4558 = vmatprep.mubr.f32.mxu1 %v5678_v29 }
  0x30   :  { %4920 = vmatpush3.bf16.msra.mxu0 %v4917_v13  ;;  %5208 = vmatpush3.bf16.msra.mxu1 %v4917_v13  ;;  %v5942_v13 = vpack.c.bf16 %v683_v2, %v680_v0 }
  0x31   :  { %4922 = vmatprep.subr.bf16.mxu0 %v4921_v21  ;;  %5210 = vmatprep.subr.bf16.mxu1 %v4921_v21 }
  0x34   :  { %4924 = vmatpush3.bf16.msra.mxu0 %v4921_v21  ;;  %5212 = vmatpush3.bf16.msra.mxu1 %v4921_v21  ;;  %v5956_v21 = vsub.f32 %v656_v58, %v680_v0 }
  0x35   :  { %4926 = vmatprep.subr.bf16.mxu0 %v4925_v31  ;;  %5214 = vmatprep.subr.bf16.mxu1 %v4925_v31 }
  0x38   :  { %4928 = vmatpush3.bf16.msra.mxu0 %v4925_v31  ;;  %5216 = vmatpush3.bf16.msra.mxu1 %v4925_v31 }
  0x39   :  { %4178 = vmatprep.subr.mxu0 %v203_v47  ;;  %4556 = vmatprep.subr.mxu1 %v203_v47 }
  0x3c   :  { %4179 = vmatpush3.msra.mxu0 %v203_v47  ;;  %4557 = vmatpush3.msra.mxu1 %v203_v47 }
  0x3d   :  { %4930 = vmatprep.subr.bf16.mxu0 %v4929_v48  ;;  %5218 = vmatprep.subr.bf16.mxu1 %v4929_v48 }
  0x3e   :  { %4181 = vmatmul.mubr.f32.vlgmr.msra.gmra.mrb[0].mxu0 %v5688_v34  ;;  %4559 = vmatmul.mubr.f32.vlgmr.msra.gmra.mrb[0].mxu1 %v5690_v35 }
  0x3f   :  { %4932 = vmatpush3.bf16.msra.mxu0 %v4929_v48  ;;  %5220 = vmatpush3.bf16.msra.mxu1 %v4929_v48 }
  0x40   :  { %4934 = vmatprep.subr.bf16.mxu0 %v4933_v49  ;;  %5222 = vmatprep.subr.bf16.mxu1 %v4933_v49 }
  0x41   :  { %4201 = vmatprep.mubr.f32.mxu0 %v5685_v32  ;;  %4579 = vmatprep.mubr.f32.mxu1 %v5693_v36  ;;  %v4961_v32 = vpack.c.bf16 %v152_v33, %v145_v28  ;;  %v4965_v36 = vpack.c.bf16 %v166_v45, %v159_v44  ;;  %v649_v28 = vld [vmem:[%s6364_s0 + $0x1] sm:$0xff]  ;;  %v3741_v33 = vld [vmem:[%s6364_s0 + $0x19] sm:$0xff]  ;;  %v655_v45 = vld [vmem:[#allocation2 + $0x60] sm:$0xff] }
  0x42   :  { %v662_v37 = vsel %vm41_vm0, %v649_v28, 0  ;;  %v2504_v38 = vsel %vm41_vm0, %v3741_v33, 0  ;;  %v653_v44 = vld [vmem:[#allocation2 + $0x50] sm:$0xff]  ;;  %v677_v56 = vand.u32 4294901760, %v655_v45 }
  0x43   :  { %4936 = vmatpush3.bf16.msra.mxu0 %v4933_v49  ;;  %5224 = vmatpush3.bf16.msra.mxu1 %v4933_v49 }
  0x44   :  { %4938 = vmatprep.subr.bf16.mxu0 %v4937_v50  ;;  %5226 = vmatprep.subr.bf16.mxu1 %v4937_v50  ;;  %v5936_v11 = vsub.f32 %v655_v45, %v677_v56 }
  0x46   :  { %v785_v20 = vand.u32 4294901760, %v5936_v11 }
  0x47   :  { %4940 = vmatpush3.bf16.msra.mxu0 %v4937_v50  ;;  %5228 = vmatpush3.bf16.msra.mxu1 %v4937_v50 }
  0x48   :  { %4942 = vmatprep.subr.bf16.mxu0 %v4941_v54  ;;  %5230 = vmatprep.subr.bf16.mxu1 %v4941_v54  ;;  %v786_v50 = vsub.f32 %v5936_v11, %v785_v20 }
  0x4b   :  { %4944 = vmatpush3.bf16.msra.mxu0 %v4941_v54  ;;  %5232 = vmatpush3.bf16.msra.mxu1 %v4941_v54  ;;  %v792_v54 = vand.u32 4294901760, %v5956_v21 }
  0x4c   :  { %4199 = vmatprep.subr.mxu0 %v5775_v15  ;;  %4577 = vmatprep.subr.mxu1 %v5775_v15 }
  0x4f   :  { %4200 = vmatpush3.msra.mxu0 %v5775_v15  ;;  %4578 = vmatpush3.msra.mxu1 %v5775_v15  ;;  %v689_v15 = vand.u32 4294901760, %v659_v6 }
  0x50   :  { %4946 = vmatprep.subr.bf16.mxu0 %v5643_v14  ;;  %5234 = vmatprep.subr.bf16.mxu1 %v5643_v14 }
  0x51   :  { %4202 = vmatmul.mubr.f32.vlgmr.msra.gmra.mrb[0].mxu0 %v5701_v40  ;;  %4580 = vmatmul.mubr.f32.vlgmr.msra.gmra.mrb[0].mxu1 %v5704_v41  ;;  %v5878_v40 = vand.u32 4294901760, %v2504_v38  ;;  %v5962_v27 = vpack.c.bf16 %v689_v15, %v686_v12 }
  0x52   :  { %4948 = vmatpush3.bf16.msra.mxu0 %v5643_v14  ;;  %5236 = vmatpush3.bf16.msra.mxu1 %v5643_v14 }
  0x53   :  { %4950 = vmatprep.subr.bf16.mxu0 %v5655_v19  ;;  %5238 = vmatprep.subr.bf16.mxu1 %v5655_v19  ;;  %v5890_v41 = vsub.f32 %v2504_v38, %v5878_v40 }
  0x54   :  { %4222 = vmatprep.mubr.f32.mxu0 %v124_v39  ;;  %4600 = vmatprep.mubr.f32.mxu1 %v1973_v43  ;;  %v5876_v39 = vand.u32 4294901760, %v662_v37  ;;  %v652_v43 = vld [vmem:[#allocation2 + $0x48] sm:$0xff] }
  0x56   :  { %4952 = vmatpush3.bf16.msra.mxu0 %v5655_v19  ;;  %5240 = vmatpush3.bf16.msra.mxu1 %v5655_v19 }
  0x57   :  { %4954 = vmatprep.subr.bf16.mxu0 %v5668_v24  ;;  %5242 = vmatprep.subr.bf16.mxu1 %v5668_v24 }
  0x5a   :  { %4956 = vmatpush3.bf16.msra.mxu0 %v5668_v24  ;;  %5244 = vmatpush3.bf16.msra.mxu1 %v5668_v24 }
  0x5b   :  { %4958 = vmatprep.subr.bf16.mxu0 %v5708_v42  ;;  %5246 = vmatprep.subr.bf16.mxu1 %v5708_v42 }
  0x5e   :  { %4960 = vmatpush3.bf16.msra.mxu0 %v5708_v42  ;;  %5248 = vmatpush3.bf16.msra.mxu1 %v5708_v42 }
  0x5f   :  { %4220 = vmatprep.subr.mxu0 %v5739_v57  ;;  %4598 = vmatprep.subr.mxu1 %v5739_v57 }
  0x62   :  { %4221 = vmatpush3.msra.mxu0 %v5739_v57  ;;  %4599 = vmatpush3.msra.mxu1 %v5739_v57 }
  0x63   :  { %4962 = vmatprep.subr.bf16.mxu0 %v4961_v32  ;;  %5250 = vmatprep.subr.bf16.mxu1 %v4961_v32 }
  0x64   :  { %4223 = vmatmul.mubr.f32.vlgmr.msra.gmra.mrb[0].mxu0 %v134_v51  ;;  %4601 = vmatmul.mubr.f32.vlgmr.msra.gmra.mrb[0].mxu1 %v1983_v52  ;;  %v2585_v52 = vand.u32 4294901760, %v5890_v41 }
  0x65   :  { %4964 = vmatpush3.bf16.msra.mxu0 %v4961_v32  ;;  %5252 = vmatpush3.bf16.msra.mxu1 %v4961_v32  ;;  %v799_v32 = vand.u32 4294901760, %v5958_v23 }
  0x66   :  { %4966 = vmatprep.subr.bf16.mxu0 %v4965_v36  ;;  %5254 = vmatprep.subr.bf16.mxu1 %v4965_v36  ;;  %v2586_v62 = vsub.f32 %v5890_v41, %v2585_v52 }
  0x67   :  { %4243 = vmatprep.mubr.f32.mxu0 %v5670_v25  ;;  %4621 = vmatprep.mubr.f32.mxu1 %v5678_v29 }
  0x68   :  { %v2587_v8 = vand.u32 4294901760, %v2586_v62 }
  0x69   :  { %4968 = vmatpush3.bf16.msra.mxu0 %v4965_v36  ;;  %5256 = vmatpush3.bf16.msra.mxu1 %v4965_v36  ;;  %v5982_v36 = vsub.f32 %v658_v3, %v686_v12 }
  0x6a   :  { %4970 = vmatprep.subr.bf16.mxu0 %v4969_v22  ;;  %5258 = vmatprep.subr.bf16.mxu1 %v4969_v22 }
  0x6d   :  { %4972 = vmatpush3.bf16.msra.mxu0 %v4969_v22  ;;  %5260 = vmatpush3.bf16.msra.mxu1 %v4969_v22  ;;  %v5984_v22 = vsub.f32 %v659_v6, %v689_v15 }
  0x6e   :  { %4974 = vmatprep.subr.bf16.mxu0 %v4973_v26  ;;  %5262 = vmatprep.subr.bf16.mxu1 %v4973_v26 }
  0x6f   :  { %v813_v45 = vand.u32 4294901760, %v5984_v22 }
  0x71   :  { %4976 = vmatpush3.bf16.msra.mxu0 %v4973_v26  ;;  %5264 = vmatpush3.bf16.msra.mxu1 %v4973_v26  ;;  %v5988_v26 = vand.u32 4294901760, %v660_v46 }
  0x72   :  { %4241 = vmatprep.subr.mxu0 %v5786_v30  ;;  %4619 = vmatprep.subr.mxu1 %v5786_v30 }
  0x73   :  { %v6009_v58 = vsub.f32 %v660_v46, %v5988_v26  ;;  %v1263_v46 = vld [vmem:[%s6364_s0 + $0xa] sm:$0xff] }
  0x75   :  { %4242 = vmatpush3.msra.mxu0 %v5786_v30  ;;  %4620 = vmatpush3.msra.mxu1 %v5786_v30  ;;  %v6020_v3 = vand.u32 4294901760, %v6009_v58 }
  0x76   :  { %4978 = vmatprep.subr.bf16.mxu0 %v5643_v14  ;;  %5266 = vmatprep.subr.bf16.mxu1 %v5643_v14 }
  0x77   :  { %4244 = vmatmul.mubr.f32.vlgmr.msra.gmra.mrb[0].mxu0 %v5688_v34  ;;  %4622 = vmatmul.mubr.f32.vlgmr.msra.gmra.mrb[0].mxu1 %v5690_v35 }
  0x78   :  { %4980 = vmatpush3.bf16.msra.mxu0 %v5643_v14  ;;  %5268 = vmatpush3.bf16.msra.mxu1 %v5643_v14  ;;  %v5887_v14 = vsub.f32 %v662_v37, %v5876_v39 }
  0x79   :  { %4982 = vmatprep.subr.bf16.mxu0 %v5655_v19  ;;  %5270 = vmatprep.subr.bf16.mxu1 %v5655_v19 }
  0x7a   :  { %4264 = vmatprep.mubr.f32.mxu0 %v5670_v25  ;;  %4642 = vmatprep.mubr.f32.mxu1 %v5678_v29  ;;  %v671_v25 = vand.u32 4294901760, %v653_v44  ;;  %v654_v29 = vld [vmem:[#allocation2 + $0x58] sm:$0xff]  ;;  %v743_v51 = vand.u32 4294901760, %v5887_v14 }
  0x7b   :  { %v674_v55 = vand.u32 4294901760, %v654_v29 }
  0x7c   :  { %4984 = vmatpush3.bf16.msra.mxu0 %v5655_v19  ;;  %5272 = vmatpush3.bf16.msra.mxu1 %v5655_v19  ;;  %v668_v19 = vand.u32 4294901760, %v652_v43  ;;  %v744_v61 = vsub.f32 %v5887_v14, %v743_v51  ;;  %v5924_v5 = vsub.f32 %v653_v44, %v671_v25  ;;  %v787_v44 = vand.u32 4294901760, %v786_v50  ;;  %v1270_v50 = vld [vmem:[#allocation2 + $0xb8] sm:$0xff] }
  0x7d   :  { %4986 = vmatprep.subr.bf16.mxu0 %v5668_v24  ;;  %5274 = vmatprep.subr.bf16.mxu1 %v5668_v24  ;;  %v5920_v1 = vpack.c.bf16 %v677_v56, %v674_v55 }
  0x7e   :  { %v5908_v59 = vpack.c.bf16 %v671_v25, %v668_v19  ;;  %v5922_v4 = vsub.f32 %v652_v43, %v668_v19  ;;  %v745_v7 = vand.u32 4294901760, %v744_v61  ;;  %v793_v19 = vsub.f32 %v5956_v21, %v792_v54 }
  0x7f   :  { %v800_v25 = vsub.f32 %v5958_v23, %v799_v32 }
  0x80   :  { %4988 = vmatpush3.bf16.msra.mxu0 %v5668_v24  ;;  %5276 = vmatpush3.bf16.msra.mxu1 %v5668_v24  ;;  %v3742_v24 = vld [vmem:[%s6364_s0 + $0x21] sm:$0xff]  ;;  %v794_v60 = vand.u32 4294901760, %v793_v19  ;;  %v5025_v12 = vpack.c.bf16 %v5924_v5, %v5922_v4  ;;  %v1272_v19 = vld [vmem:[#allocation2 + $0xc8] sm:$0xff] }
  0x81   :  { %4990 = vmatprep.subr.bf16.mxu0 %v5708_v42  ;;  %5278 = vmatprep.subr.bf16.mxu1 %v5708_v42  ;;  %v2507_v63 = vsel %vm41_vm0, %v3742_v24, 0  ;;  %v801_v61 = vand.u32 4294901760, %v800_v25 }
  0x82   :  { %v5930_v10 = vand.u32 4294901760, %v2507_v63 }
  0x84   :  { %4992 = vmatpush3.bf16.msra.mxu0 %v5708_v42  ;;  %5280 = vmatpush3.bf16.msra.mxu1 %v5708_v42  ;;  %v665_v42 = vsel %vm41_vm0, %v650_v53, 0  ;;  %v5950_v17 = vsub.f32 %v2507_v63, %v5930_v10  ;;  %v5017_v63 = vpack.c.bf16 %v801_v61, %v794_v60 }
  0x85   :  { %4262 = vmatprep.subr.mxu0 %v5739_v57  ;;  %4640 = vmatprep.subr.mxu1 %v5739_v57  ;;  %v5928_v9 = vand.u32 4294901760, %v665_v42 }
  0x86   :  { %v2595_v48 = vand.u32 4294901760, %v5950_v17 }
  0x87   :  { %v5947_v16 = vsub.f32 %v665_v42, %v5928_v9  ;;  %v814_v42 = vsub.f32 %v5984_v22, %v813_v45 }
  0x88   :  { %4263 = vmatpush3.msra.mxu0 %v5739_v57  ;;  %4641 = vmatpush3.msra.mxu1 %v5739_v57  ;;  %v5934_v57 = vsub.f32 %v654_v29, %v674_v55  ;;  %v2596_v38 = vsub.f32 %v5950_v17, %v2595_v48  ;;  %v806_v29 = vand.u32 4294901760, %v5982_v36 }
  0x89   :  { %4994 = vmatprep.subr.bf16.mxu0 %v5908_v59  ;;  %5282 = vmatprep.subr.bf16.mxu1 %v5908_v59  ;;  %v753_v47 = vand.u32 4294901760, %v5947_v16  ;;  %v815_v2 = vand.u32 4294901760, %v814_v42 }
  0x8a   :  { %4265 = vmatmul.mubr.f32.vlgmr.msra.gmra.mrb[0].mxu0 %v5688_v34  ;;  %4643 = vmatmul.mubr.f32.vlgmr.msra.gmra.mrb[0].mxu1 %v5690_v35  ;;  %v764_v34 = vand.u32 4294901760, %v5922_v4  ;;  %v771_v35 = vand.u32 4294901760, %v5924_v5  ;;  %v778_v18 = vand.u32 4294901760, %v5934_v57  ;;  %v2597_v55 = vand.u32 4294901760, %v2596_v38 }
  0x8b   :  { %4996 = vmatpush3.bf16.msra.mxu0 %v5908_v59  ;;  %5284 = vmatpush3.bf16.msra.mxu1 %v5908_v59  ;;  %v754_v37 = vsub.f32 %v5947_v16, %v753_v47  ;;  %v807_v62 = vsub.f32 %v5982_v36, %v806_v29  ;;  %v5029_v15 = vpack.c.bf16 %v5936_v11, %v5934_v57 }
  0x8c   :  { %4998 = vmatprep.subr.bf16.mxu0 %v5920_v1  ;;  %5286 = vmatprep.subr.bf16.mxu1 %v5920_v1  ;;  %v765_v30 = vsub.f32 %v5922_v4, %v764_v34  ;;  %v772_v31 = vsub.f32 %v5924_v5, %v771_v35  ;;  %v779_v49 = vsub.f32 %v5934_v57, %v778_v18  ;;  %v1262_v4 = vld [vmem:[%s6364_s0 + $0x2] sm:$0xff]  ;;  %v3743_v5 = vld [vmem:[%s6364_s0 + $0x1a] sm:$0xff] }
  0x8d   :  { %4285 = vmatprep.mubr.f32.mxu0 %v745_v7  ;;  %4663 = vmatprep.mubr.f32.mxu1 %v2587_v8  ;;  %v755_v24 = vand.u32 4294901760, %v754_v37  ;;  %v808_v0 = vand.u32 4294901760, %v807_v62  ;;  %v821_v7 = vsub.f32 %v6009_v58, %v6020_v3  ;;  %v1275_v57 = vsel %vm41_vm0, %v1262_v4, 0 }
  0x8e   :  { %v766_v28 = vand.u32 4294901760, %v765_v30  ;;  %v773_v33 = vand.u32 4294901760, %v772_v31  ;;  %v780_v43 = vand.u32 4294901760, %v779_v49  ;;  %v5033_v30 = vpack.c.bf16 %v5958_v23, %v5956_v21  ;;  %v1269_v49 = vld [vmem:[#allocation2 + $0xb0] sm:$0xff] }
  0x8f   :  { %5000 = vmatpush3.bf16.msra.mxu0 %v5920_v1  ;;  %5288 = vmatpush3.bf16.msra.mxu1 %v5920_v1  ;;  %v5021_v6 = vpack.c.bf16 %v815_v2, %v808_v0  ;;  %v822_v8 = vand.u32 4294901760, %v821_v7  ;;  %v5037_v31 = vpack.c.bf16 %v5984_v22, %v5982_v36  ;;  %v3116_v11 = vsel %vm41_vm0, %v3743_v5, 0  ;;  %v1273_v7 = vld [vmem:[#allocation2 + $0xd0] sm:$0xff] }
  0x90   :  { %5002 = vmatprep.subr.bf16.mxu0 %v5942_v13  ;;  %5290 = vmatprep.subr.bf16.mxu1 %v5942_v13  ;;  %v5009_v53 = vpack.c.bf16 %v773_v33, %v766_v28  ;;  %v5013_v56 = vpack.c.bf16 %v787_v44, %v780_v43  ;;  %v1293_v28 = vand.u32 4294901760, %v1269_v49  ;;  %v1296_v33 = vand.u32 4294901760, %v1270_v50  ;;  %v1271_v44 = vld [vmem:[#allocation2 + $0xc0] sm:$0xff] }
  0x92   :  { %v6192_v0 = vsub.f32 %v1270_v50, %v1296_v33 }
  0x93   :  { %5004 = vmatpush3.bf16.msra.mxu0 %v5942_v13  ;;  %5292 = vmatpush3.bf16.msra.mxu1 %v5942_v13 }
  0x94   :  { %5006 = vmatprep.subr.bf16.mxu0 %v5962_v27  ;;  %5294 = vmatprep.subr.bf16.mxu1 %v5962_v27 }
  0x97   :  { %5008 = vmatpush3.bf16.msra.mxu0 %v5962_v27  ;;  %5296 = vmatpush3.bf16.msra.mxu1 %v5962_v27 }
  0x98   :  { %4283 = vmatprep.subr.mxu0 %v5988_v26  ;;  %4661 = vmatprep.subr.mxu1 %v5988_v26 }
  0x9b   :  { %4284 = vmatpush3.msra.mxu0 %v5988_v26  ;;  %4662 = vmatpush3.msra.mxu1 %v5988_v26 }
  0x9c   :  { %5010 = vmatprep.subr.bf16.mxu0 %v5009_v53  ;;  %5298 = vmatprep.subr.bf16.mxu1 %v5009_v53 }
  0x9d   :  { %4286 = vmatmul.mubr.f32.vlgmr.msra.gmra.mrb[0].mxu0 %v755_v24  ;;  %4664 = vmatmul.mubr.f32.vlgmr.msra.gmra.mrb[0].mxu1 %v2597_v55  ;;  %v6174_v55 = vpack.c.bf16 %v1296_v33, %v1293_v28 }
  0x9e   :  { %5012 = vmatpush3.bf16.msra.mxu0 %v5009_v53  ;;  %5300 = vmatpush3.bf16.msra.mxu1 %v5009_v53 }
  0x9f   :  { %5014 = vmatprep.subr.bf16.mxu0 %v5013_v56  ;;  %5302 = vmatprep.subr.bf16.mxu1 %v5013_v56 }
  0xa0   :  { %4306 = vmatprep.mubr.f32.mxu0 %v5876_v39  ;;  %4684 = vmatprep.mubr.f32.mxu1 %v5878_v40 }
  0xa2   :  { %5016 = vmatpush3.bf16.msra.mxu0 %v5013_v56  ;;  %5304 = vmatpush3.bf16.msra.mxu1 %v5013_v56  ;;  %v1299_v56 = vand.u32 4294901760, %v1271_v44 }
  0xa3   :  { %5018 = vmatprep.subr.bf16.mxu0 %v5017_v63  ;;  %5306 = vmatprep.subr.bf16.mxu1 %v5017_v63 }
  0xa6   :  { %5020 = vmatpush3.bf16.msra.mxu0 %v5017_v63  ;;  %5308 = vmatpush3.bf16.msra.mxu1 %v5017_v63  ;;  %v6188_v63 = vsub.f32 %v1269_v49, %v1293_v28 }
  0xa7   :  { %5022 = vmatprep.subr.bf16.mxu0 %v5021_v6  ;;  %5310 = vmatprep.subr.bf16.mxu1 %v5021_v6 }
  0xaa   :  { %5024 = vmatpush3.bf16.msra.mxu0 %v5021_v6  ;;  %5312 = vmatpush3.bf16.msra.mxu1 %v5021_v6 }
  0xab   :  { %4304 = vmatprep.subr.mxu0 %v822_v8  ;;  %4682 = vmatprep.subr.mxu1 %v822_v8 }
  0xae   :  { %4305 = vmatpush3.msra.mxu0 %v822_v8  ;;  %4683 = vmatpush3.msra.mxu1 %v822_v8 }
  0xaf   :  { %5026 = vmatprep.subr.bf16.mxu0 %v5025_v12  ;;  %5314 = vmatprep.subr.bf16.mxu1 %v5025_v12 }
  0xb0   :  { %4307 = vmatmul.mubr.f32.vlgmr.msra.gmra.mrb[0].mxu0 %v5928_v9  ;;  %4685 = vmatmul.mubr.f32.vlgmr.msra.gmra.mrb[0].mxu1 %v5930_v10 }
  0xb1   :  { %5028 = vmatpush3.bf16.msra.mxu0 %v5025_v12  ;;  %5316 = vmatpush3.bf16.msra.mxu1 %v5025_v12 }
  0xb2   :  { %5030 = vmatprep.subr.bf16.mxu0 %v5029_v15  ;;  %5318 = vmatprep.subr.bf16.mxu1 %v5029_v15 }
  0xb3   :  { %4327 = vmatprep.mubr.f32.mxu0 %v5887_v14  ;;  %4705 = vmatprep.mubr.f32.mxu1 %v5890_v41  ;;  %v5057_v14 = vpack.c.bf16 %v771_v35, %v764_v34  ;;  %v5061_v41 = vpack.c.bf16 %v785_v20, %v778_v18  ;;  %v6110_v34 = vand.u32 4294901760, %v1275_v57  ;;  %v6112_v35 = vand.u32 4294901760, %v3116_v11  ;;  %v1266_v18 = vld [vmem:[#allocation2 + $0x98] sm:$0xff]  ;;  %v1268_v20 = vld [vmem:[#allocation2 + $0xa8] sm:$0xff] }
  0xb5   :  { %5032 = vmatpush3.bf16.msra.mxu0 %v5029_v15  ;;  %5320 = vmatpush3.bf16.msra.mxu1 %v5029_v15 }
  0xb6   :  { %5034 = vmatprep.subr.bf16.mxu0 %v5033_v30  ;;  %5322 = vmatprep.subr.bf16.mxu1 %v5033_v30 }
  0xb9   :  { %5036 = vmatpush3.bf16.msra.mxu0 %v5033_v30  ;;  %5324 = vmatpush3.bf16.msra.mxu1 %v5033_v30 }
  0xba   :  { %5038 = vmatprep.subr.bf16.mxu0 %v5037_v31  ;;  %5326 = vmatprep.subr.bf16.mxu1 %v5037_v31 }
  0xbd   :  { %5040 = vmatpush3.bf16.msra.mxu0 %v5037_v31  ;;  %5328 = vmatpush3.bf16.msra.mxu1 %v5037_v31  ;;  %v1405_v31 = vand.u32 4294901760, %v6188_v63 }
  0xbe   :  { %4325 = vmatprep.subr.mxu0 %v6009_v58  ;;  %4703 = vmatprep.subr.mxu1 %v6009_v58 }
  0xc1   :  { %4326 = vmatpush3.msra.mxu0 %v6009_v58  ;;  %4704 = vmatpush3.msra.mxu1 %v6009_v58  ;;  %v1302_v58 = vand.u32 4294901760, %v1272_v19 }
  0xc2   :  { %5042 = vmatprep.subr.bf16.mxu0 %v5908_v59  ;;  %5330 = vmatprep.subr.bf16.mxu1 %v5908_v59 }
  0xc3   :  { %4328 = vmatmul.mubr.f32.vlgmr.msra.gmra.mrb[0].mxu0 %v5947_v16  ;;  %4706 = vmatmul.mubr.f32.vlgmr.msra.gmra.mrb[0].mxu1 %v5950_v17  ;;  %v6124_v16 = vsub.f32 %v3116_v11, %v6112_v35  ;;  %v1265_v17 = vld [vmem:[#allocation2 + $0x90] sm:$0xff]  ;;  %v6196_v2 = vpack.c.bf16 %v1302_v58, %v1299_v56 }
  0xc4   :  { %5044 = vmatpush3.bf16.msra.mxu0 %v5908_v59  ;;  %5332 = vmatpush3.bf16.msra.mxu1 %v5908_v59 }
  0xc5   :  { %5046 = vmatprep.subr.bf16.mxu0 %v5920_v1  ;;  %5334 = vmatprep.subr.bf16.mxu1 %v5920_v1  ;;  %v3197_v23 = vand.u32 4294901760, %v6124_v16 }
  0xc6   :  { %4348 = vmatprep.mubr.f32.mxu0 %v743_v51  ;;  %4726 = vmatprep.mubr.f32.mxu1 %v2585_v52  ;;  %v5065_v51 = vpack.c.bf16 %v799_v32, %v792_v54  ;;  %v5069_v52 = vpack.c.bf16 %v813_v45, %v806_v29 }
  0xc7   :  { %v3198_v36 = vsub.f32 %v6124_v16, %v3197_v23 }
  0xc8   :  { %5048 = vmatpush3.bf16.msra.mxu0 %v5920_v1  ;;  %5336 = vmatpush3.bf16.msra.mxu1 %v5920_v1 }
  0xc9   :  { %5050 = vmatprep.subr.bf16.mxu0 %v5942_v13  ;;  %5338 = vmatprep.subr.bf16.mxu1 %v5942_v13  ;;  %v3199_v29 = vand.u32 4294901760, %v3198_v36 }
  0xcc   :  { %5052 = vmatpush3.bf16.msra.mxu0 %v5942_v13  ;;  %5340 = vmatpush3.bf16.msra.mxu1 %v5942_v13 }
  0xcd   :  { %5054 = vmatprep.subr.bf16.mxu0 %v5962_v27  ;;  %5342 = vmatprep.subr.bf16.mxu1 %v5962_v27 }
  0xd0   :  { %5056 = vmatpush3.bf16.msra.mxu0 %v5962_v27  ;;  %5344 = vmatpush3.bf16.msra.mxu1 %v5962_v27 }
  0xd1   :  { %4346 = vmatprep.subr.mxu0 %v5988_v26  ;;  %4724 = vmatprep.subr.mxu1 %v5988_v26 }
  0xd4   :  { %4347 = vmatpush3.msra.mxu0 %v5988_v26  ;;  %4725 = vmatpush3.msra.mxu1 %v5988_v26 }
  0xd5   :  { %5058 = vmatprep.subr.bf16.mxu0 %v5057_v14  ;;  %5346 = vmatprep.subr.bf16.mxu1 %v5057_v14 }
  0xd6   :  { %4349 = vmatmul.mubr.f32.vlgmr.msra.gmra.mrb[0].mxu0 %v753_v47  ;;  %4727 = vmatmul.mubr.f32.vlgmr.msra.gmra.mrb[0].mxu1 %v2595_v48  ;;  %v1290_v48 = vand.u32 4294901760, %v1268_v20 }
  0xd7   :  { %5060 = vmatpush3.bf16.msra.mxu0 %v5057_v14  ;;  %5348 = vmatpush3.bf16.msra.mxu1 %v5057_v14  ;;  %v1412_v14 = vand.u32 4294901760, %v6192_v0 }
  0xd8   :  { %5062 = vmatprep.subr.bf16.mxu0 %v5061_v41  ;;  %5350 = vmatprep.subr.bf16.mxu1 %v5061_v41  ;;  %v6170_v24 = vsub.f32 %v1268_v20, %v1290_v48 }
  0xd9   :  { %4369 = vmatprep.mubr.f32.mxu0 %v5876_v39  ;;  %4747 = vmatprep.mubr.f32.mxu1 %v5878_v40 }
  0xda   :  { %v1398_v42 = vand.u32 4294901760, %v6170_v24 }
  0xdb   :  { %5064 = vmatpush3.bf16.msra.mxu0 %v5061_v41  ;;  %5352 = vmatpush3.bf16.msra.mxu1 %v5061_v41  ;;  %v6216_v41 = vsub.f32 %v1271_v44, %v1299_v56 }
  0xdc   :  { %5066 = vmatprep.subr.bf16.mxu0 %v5065_v51  ;;  %5354 = vmatprep.subr.bf16.mxu1 %v5065_v51  ;;  %v1399_v30 = vsub.f32 %v6170_v24, %v1398_v42 }
  0xdf   :  { %5068 = vmatpush3.bf16.msra.mxu0 %v5065_v51  ;;  %5356 = vmatpush3.bf16.msra.mxu1 %v5065_v51  ;;  %v6218_v51 = vsub.f32 %v1272_v19, %v1302_v58 }
  0xe0   :  { %5070 = vmatprep.subr.bf16.mxu0 %v5069_v52  ;;  %5358 = vmatprep.subr.bf16.mxu1 %v5069_v52 }
  0xe1   :  { %v1426_v20 = vand.u32 4294901760, %v6218_v51 }
  0xe3   :  { %5072 = vmatpush3.bf16.msra.mxu0 %v5069_v52  ;;  %5360 = vmatpush3.bf16.msra.mxu1 %v5069_v52  ;;  %v6222_v52 = vand.u32 4294901760, %v1273_v7  ;;  %v1427_v36 = vsub.f32 %v6218_v51, %v1426_v20 }
  0xe4   :  { %4367 = vmatprep.subr.mxu0 %v6020_v3  ;;  %4745 = vmatprep.subr.mxu1 %v6020_v3 }
  0xe5   :  { %v1428_v33 = vand.u32 4294901760, %v1427_v36 }
  0xe7   :  { %4368 = vmatpush3.msra.mxu0 %v6020_v3  ;;  %4746 = vmatpush3.msra.mxu1 %v6020_v3 }
  0xe8   :  { %5074 = vmatprep.subr.bf16.mxu0 %v5908_v59  ;;  %5362 = vmatprep.subr.bf16.mxu1 %v5908_v59 }
  0xe9   :  { %4370 = vmatmul.mubr.f32.vlgmr.msra.gmra.mrb[0].mxu0 %v5928_v9  ;;  %4748 = vmatmul.mubr.f32.vlgmr.msra.gmra.mrb[0].mxu1 %v5930_v10 }
  0xea   :  { %5076 = vmatpush3.bf16.msra.mxu0 %v5908_v59  ;;  %5364 = vmatpush3.bf16.msra.mxu1 %v5908_v59  ;;  %v6121_v59 = vsub.f32 %v1275_v57, %v6110_v34 }
  0xeb   :  { %5078 = vmatprep.subr.bf16.mxu0 %v5920_v1  ;;  %5366 = vmatprep.subr.bf16.mxu1 %v5920_v1 }
  0xec   :  { %4390 = vmatprep.mubr.f32.mxu0 %v5876_v39  ;;  %4768 = vmatprep.mubr.f32.mxu1 %v5878_v40  ;;  %v1281_v39 = vand.u32 4294901760, %v1265_v17  ;;  %v1284_v40 = vand.u32 4294901760, %v1266_v18  ;;  %v1356_v21 = vand.u32 4294901760, %v6121_v59 }
  0xee   :  { %5080 = vmatpush3.bf16.msra.mxu0 %v5920_v1  ;;  %5368 = vmatpush3.bf16.msra.mxu1 %v5920_v1  ;;  %v1267_v1 = vld [vmem:[#allocation2 + $0xa0] sm:$0xff]  ;;  %v6142_v54 = vpack.c.bf16 %v1284_v40, %v1281_v39  ;;  %v1357_v32 = vsub.f32 %v6121_v59, %v1356_v21  ;;  %v6156_v38 = vsub.f32 %v1265_v17, %v1281_v39 }
  0xef   :  { %5082 = vmatprep.subr.bf16.mxu0 %v5942_v13  ;;  %5370 = vmatprep.subr.bf16.mxu1 %v5942_v13  ;;  %v1287_v47 = vand.u32 4294901760, %v1267_v1  ;;  %v6158_v43 = vsub.f32 %v1266_v18, %v1284_v40  ;;  %v1400_v18 = vand.u32 4294901760, %v1399_v30  ;;  %v1406_v39 = vsub.f32 %v6188_v63, %v1405_v31 }
  0xf0   :  { %v1358_v25 = vand.u32 4294901760, %v1357_v32  ;;  %v1413_v40 = vsub.f32 %v6192_v0, %v1412_v14 }
  0xf1   :  { %v6154_v37 = vpack.c.bf16 %v1290_v48, %v1287_v47  ;;  %v1407_v49 = vand.u32 4294901760, %v1406_v39  ;;  %v5121_v56 = vpack.c.bf16 %v6158_v43, %v6156_v38 }
  0xf2   :  { %5084 = vmatpush3.bf16.msra.mxu0 %v5942_v13  ;;  %5372 = vmatpush3.bf16.msra.mxu1 %v5942_v13  ;;  %v3744_v13 = vld [vmem:[%s6364_s0 + $0x22] sm:$0xff]  ;;  %v1414_v50 = vand.u32 4294901760, %v1413_v40 }
  0xf3   :  { %5086 = vmatprep.subr.bf16.mxu0 %v5962_v27  ;;  %5374 = vmatprep.subr.bf16.mxu1 %v5962_v27  ;;  %v3119_v22 = vsel %vm41_vm0, %v3744_v13, 0 }
  0xf4   :  { %v6164_v53 = vand.u32 4294901760, %v3119_v22 }
  0xf6   :  { %5088 = vmatpush3.bf16.msra.mxu0 %v5962_v27  ;;  %5376 = vmatpush3.bf16.msra.mxu1 %v5962_v27  ;;  %v1278_v27 = vsel %vm41_vm0, %v1263_v46, 0  ;;  %v6184_v61 = vsub.f32 %v3119_v22, %v6164_v53  ;;  %v5113_v22 = vpack.c.bf16 %v1414_v50, %v1407_v49 }
  0xf7   :  { %4388 = vmatprep.subr.mxu0 %v5988_v26  ;;  %4766 = vmatprep.subr.mxu1 %v5988_v26  ;;  %v6162_v45 = vand.u32 4294901760, %v1278_v27 }
  0xf8   :  { %v3207_v12 = vand.u32 4294901760, %v6184_v61 }
  0xf9   :  { %v6181_v60 = vsub.f32 %v1278_v27, %v6162_v45  ;;  %v1432_v27 = vsub.f32 %v1273_v7, %v6222_v52 }
  0xfa   :  { %4389 = vmatpush3.msra.mxu0 %v5988_v26  ;;  %4767 = vmatpush3.msra.mxu1 %v5988_v26  ;;  %v6168_v26 = vsub.f32 %v1267_v1, %v1287_v47  ;;  %v3208_v11 = vsub.f32 %v6184_v61, %v3207_v12  ;;  %v1419_v1 = vand.u32 4294901760, %v6216_v41 }
  0xfb   :  { %5090 = vmatprep.subr.bf16.mxu0 %v6142_v54  ;;  %5378 = vmatprep.subr.bf16.mxu1 %v6142_v54  ;;  %v1366_v8 = vand.u32 4294901760, %v6181_v60  ;;  %v6251_v44 = vand.u32 4294901760, %v1432_v27 }
  0xfc   :  { %4391 = vmatmul.mubr.f32.vlgmr.msra.gmra.mrb[0].mxu0 %v5928_v9  ;;  %4769 = vmatmul.mubr.f32.vlgmr.msra.gmra.mrb[0].mxu1 %v5930_v10  ;;  %v1377_v9 = vand.u32 4294901760, %v6156_v38  ;;  %v1384_v10 = vand.u32 4294901760, %v6158_v43  ;;  %v1391_v62 = vand.u32 4294901760, %v6168_v26  ;;  %v3209_v47 = vand.u32 4294901760, %v3208_v11 }
  0xfd   :  { %5092 = vmatpush3.bf16.msra.mxu0 %v6142_v54  ;;  %5380 = vmatpush3.bf16.msra.mxu1 %v6142_v54  ;;  %v1367_v57 = vsub.f32 %v6181_v60, %v1366_v8  ;;  %v1420_v32 = vsub.f32 %v6216_v41, %v1419_v1  ;;  %v5125_v58 = vpack.c.bf16 %v6170_v24, %v6168_v26 }
  0xfe   :  { %5094 = vmatprep.subr.bf16.mxu0 %v6154_v37  ;;  %5382 = vmatprep.subr.bf16.mxu1 %v6154_v37  ;;  %v1378_v3 = vsub.f32 %v6156_v38, %v1377_v9  ;;  %v1385_v6 = vsub.f32 %v6158_v43, %v1384_v10  ;;  %v1392_v15 = vsub.f32 %v6168_v26, %v1391_v62 }
  0xff   :  { %4411 = vmatprep.mubr.f32.mxu0 %v1358_v25  ;;  %4789 = vmatprep.mubr.f32.mxu1 %v3199_v29  ;;  %v1368_v13 = vand.u32 4294901760, %v1367_v57  ;;  %v1421_v28 = vand.u32 4294901760, %v1420_v32  ;;  %v1434_v25 = vsub.f32 %v1432_v27, %v6251_v44 }
 0x100   :  { %v1379_v4 = vand.u32 4294901760, %v1378_v3  ;;  %v1386_v5 = vand.u32 4294901760, %v1385_v6  ;;  %v1393_v17 = vand.u32 4294901760, %v1392_v15  ;;  %v5129_v3 = vpack.c.bf16 %v6192_v0, %v6188_v63 }
 0x101   :  { %5096 = vmatpush3.bf16.msra.mxu0 %v6154_v37  ;;  %5384 = vmatpush3.bf16.msra.mxu1 %v6154_v37  ;;  %v5117_v19 = vpack.c.bf16 %v1428_v33, %v1421_v28  ;;  %v1435_v29 = vand.u32 4294901760, %v1434_v25  ;;  %v5133_v6 = vpack.c.bf16 %v6218_v51, %v6216_v41 }
 0x102   :  { %5098 = vmatprep.subr.bf16.mxu0 %v6174_v55  ;;  %5386 = vmatprep.subr.bf16.mxu1 %v6174_v55  ;;  %v5105_v46 = vpack.c.bf16 %v1386_v5, %v1379_v4  ;;  %v5109_v48 = vpack.c.bf16 %v1400_v18, %v1393_v17 }
 0x105   :  { %5100 = vmatpush3.bf16.msra.mxu0 %v6174_v55  ;;  %5388 = vmatpush3.bf16.msra.mxu1 %v6174_v55 }
 0x106   :  { %5102 = vmatprep.subr.bf16.mxu0 %v6196_v2  ;;  %5390 = vmatprep.subr.bf16.mxu1 %v6196_v2 }
 0x109   :  { %5104 = vmatpush3.bf16.msra.mxu0 %v6196_v2  ;;  %5392 = vmatpush3.bf16.msra.mxu1 %v6196_v2 }
 0x10a   :  { %4409 = vmatprep.subr.mxu0 %v6222_v52  ;;  %4787 = vmatprep.subr.mxu1 %v6222_v52 }
 0x10d   :  { %4410 = vmatpush3.msra.mxu0 %v6222_v52  ;;  %4788 = vmatpush3.msra.mxu1 %v6222_v52 }
 0x10e   :  { %5106 = vmatprep.subr.bf16.mxu0 %v5105_v46  ;;  %5394 = vmatprep.subr.bf16.mxu1 %v5105_v46 }
 0x10f   :  { %4412 = vmatmul.mubr.f32.vlgmr.msra.gmra.mrb[0].mxu0 %v1368_v13  ;;  %4790 = vmatmul.mubr.f32.vlgmr.msra.gmra.mrb[0].mxu1 %v3209_v47 }
 0x110   :  { %5108 = vmatpush3.bf16.msra.mxu0 %v5105_v46  ;;  %5396 = vmatpush3.bf16.msra.mxu1 %v5105_v46 }
 0x111   :  { %5110 = vmatprep.subr.bf16.mxu0 %v5109_v48  ;;  %5398 = vmatprep.subr.bf16.mxu1 %v5109_v48 }
 0x112   :  { %4432 = vmatprep.mubr.f32.mxu0 %v6110_v34  ;;  %4810 = vmatprep.mubr.f32.mxu1 %v6112_v35 }
 0x114   :  { %5112 = vmatpush3.bf16.msra.mxu0 %v5109_v48  ;;  %5400 = vmatpush3.bf16.msra.mxu1 %v5109_v48 }
 0x115   :  { %5114 = vmatprep.subr.bf16.mxu0 %v5113_v22  ;;  %5402 = vmatprep.subr.bf16.mxu1 %v5113_v22 }
 0x118   :  { %5116 = vmatpush3.bf16.msra.mxu0 %v5113_v22  ;;  %5404 = vmatpush3.bf16.msra.mxu1 %v5113_v22 }
 0x119   :  { %5118 = vmatprep.subr.bf16.mxu0 %v5117_v19  ;;  %5406 = vmatprep.subr.bf16.mxu1 %v5117_v19 }
 0x11c   :  { %5120 = vmatpush3.bf16.msra.mxu0 %v5117_v19  ;;  %5408 = vmatpush3.bf16.msra.mxu1 %v5117_v19 }
 0x11d   :  { %4430 = vmatprep.subr.mxu0 %v1435_v29  ;;  %4808 = vmatprep.subr.mxu1 %v1435_v29 }
 0x120   :  { %4431 = vmatpush3.msra.mxu0 %v1435_v29  ;;  %4809 = vmatpush3.msra.mxu1 %v1435_v29 }
 0x121   :  { %5122 = vmatprep.subr.bf16.mxu0 %v5121_v56  ;;  %5410 = vmatprep.subr.bf16.mxu1 %v5121_v56 }
 0x122   :  { %4433 = vmatmul.mubr.f32.vlgmr.msra.gmra.mrb[0].mxu0 %v6162_v45  ;;  %4811 = vmatmul.mubr.f32.vlgmr.msra.gmra.mrb[0].mxu1 %v6164_v53 }
 0x123   :  { %5124 = vmatpush3.bf16.msra.mxu0 %v5121_v56  ;;  %5412 = vmatpush3.bf16.msra.mxu1 %v5121_v56 }
 0x124   :  { %5126 = vmatprep.subr.bf16.mxu0 %v5125_v58  ;;  %5414 = vmatprep.subr.bf16.mxu1 %v5125_v58 }
 0x125   :  { %4453 = vmatprep.mubr.f32.mxu0 %v6121_v59  ;;  %4831 = vmatprep.mubr.f32.mxu1 %v6124_v16  ;;  %v5153_v59 = vpack.c.bf16 %v1384_v10, %v1377_v9  ;;  %v5157_v16 = vpack.c.bf16 %v1398_v42, %v1391_v62 }
 0x127   :  { %5128 = vmatpush3.bf16.msra.mxu0 %v5125_v58  ;;  %5416 = vmatpush3.bf16.msra.mxu1 %v5125_v58 }
 0x128   :  { %5130 = vmatprep.subr.bf16.mxu0 %v5129_v3  ;;  %5418 = vmatprep.subr.bf16.mxu1 %v5129_v3 }
 0x12b   :  { %5132 = vmatpush3.bf16.msra.mxu0 %v5129_v3  ;;  %5420 = vmatpush3.bf16.msra.mxu1 %v5129_v3 }
 0x12c   :  { %5134 = vmatprep.subr.bf16.mxu0 %v5133_v6  ;;  %5422 = vmatprep.subr.bf16.mxu1 %v5133_v6 }
 0x12f   :  { %5136 = vmatpush3.bf16.msra.mxu0 %v5133_v6  ;;  %5424 = vmatpush3.bf16.msra.mxu1 %v5133_v6 }
 0x130   :  { %4451 = vmatprep.subr.mxu0 %v1432_v27  ;;  %4829 = vmatprep.subr.mxu1 %v1432_v27 }
 0x133   :  { %4452 = vmatpush3.msra.mxu0 %v1432_v27  ;;  %4830 = vmatpush3.msra.mxu1 %v1432_v27 }
 0x134   :  { %5138 = vmatprep.subr.bf16.mxu0 %v6142_v54  ;;  %5426 = vmatprep.subr.bf16.mxu1 %v6142_v54 }
 0x135   :  { %4454 = vmatmul.mubr.f32.vlgmr.msra.gmra.mrb[0].mxu0 %v6181_v60  ;;  %4832 = vmatmul.mubr.f32.vlgmr.msra.gmra.mrb[0].mxu1 %v6184_v61 }
 0x136   :  { %5140 = vmatpush3.bf16.msra.mxu0 %v6142_v54  ;;  %5428 = vmatpush3.bf16.msra.mxu1 %v6142_v54 }
 0x137   :  { %5142 = vmatprep.subr.bf16.mxu0 %v6154_v37  ;;  %5430 = vmatprep.subr.bf16.mxu1 %v6154_v37 }
 0x138   :  { %4474 = vmatprep.mubr.f32.mxu0 %v1356_v21  ;;  %4852 = vmatprep.mubr.f32.mxu1 %v3197_v23  ;;  %v5161_v21 = vpack.c.bf16 %v1412_v14, %v1405_v31  ;;  %v5165_v23 = vpack.c.bf16 %v1426_v20, %v1419_v1 }
 0x13a   :  { %5144 = vmatpush3.bf16.msra.mxu0 %v6154_v37  ;;  %5432 = vmatpush3.bf16.msra.mxu1 %v6154_v37 }
 0x13b   :  { %5146 = vmatprep.subr.bf16.mxu0 %v6174_v55  ;;  %5434 = vmatprep.subr.bf16.mxu1 %v6174_v55 }
 0x13e   :  { %5148 = vmatpush3.bf16.msra.mxu0 %v6174_v55  ;;  %5436 = vmatpush3.bf16.msra.mxu1 %v6174_v55 }
 0x13f   :  { %5150 = vmatprep.subr.bf16.mxu0 %v6196_v2  ;;  %5438 = vmatprep.subr.bf16.mxu1 %v6196_v2 }
 0x142   :  { %5152 = vmatpush3.bf16.msra.mxu0 %v6196_v2  ;;  %5440 = vmatpush3.bf16.msra.mxu1 %v6196_v2 }
 0x143   :  { %4472 = vmatprep.subr.mxu0 %v6222_v52  ;;  %4850 = vmatprep.subr.mxu1 %v6222_v52 }
 0x146   :  { %4473 = vmatpush3.msra.mxu0 %v6222_v52  ;;  %4851 = vmatpush3.msra.mxu1 %v6222_v52 }
 0x147   :  { %5154 = vmatprep.subr.bf16.mxu0 %v5153_v59  ;;  %5442 = vmatprep.subr.bf16.mxu1 %v5153_v59 }
 0x148   :  { %4475 = vmatmul.mubr.f32.vlgmr.msra.gmra.mrb[0].mxu0 %v1366_v8  ;;  %4853 = vmatmul.mubr.f32.vlgmr.msra.gmra.mrb[0].mxu1 %v3207_v12 }
 0x149   :  { %5156 = vmatpush3.bf16.msra.mxu0 %v5153_v59  ;;  %5444 = vmatpush3.bf16.msra.mxu1 %v5153_v59 }
 0x14a   :  { %5158 = vmatprep.subr.bf16.mxu0 %v5157_v16  ;;  %5446 = vmatprep.subr.bf16.mxu1 %v5157_v16 }
 0x14b   :  { %4495 = vmatprep.mubr.f32.mxu0 %v6110_v34  ;;  %4873 = vmatprep.mubr.f32.mxu1 %v6112_v35 }
 0x14d   :  { %5160 = vmatpush3.bf16.msra.mxu0 %v5157_v16  ;;  %5448 = vmatpush3.bf16.msra.mxu1 %v5157_v16 }
 0x14e   :  { %5162 = vmatprep.subr.bf16.mxu0 %v5161_v21  ;;  %5450 = vmatprep.subr.bf16.mxu1 %v5161_v21 }
 0x151   :  { %5164 = vmatpush3.bf16.msra.mxu0 %v5161_v21  ;;  %5452 = vmatpush3.bf16.msra.mxu1 %v5161_v21 }
 0x152   :  { %5166 = vmatprep.subr.bf16.mxu0 %v5165_v23  ;;  %5454 = vmatprep.subr.bf16.mxu1 %v5165_v23 }
 0x155   :  { %5168 = vmatpush3.bf16.msra.mxu0 %v5165_v23  ;;  %5456 = vmatpush3.bf16.msra.mxu1 %v5165_v23 }
 0x156   :  { %4493 = vmatprep.subr.mxu0 %v6251_v44  ;;  %4871 = vmatprep.subr.mxu1 %v6251_v44 }
 0x159   :  { %4494 = vmatpush3.msra.mxu0 %v6251_v44  ;;  %4872 = vmatpush3.msra.mxu1 %v6251_v44 }
 0x15a   :  { %5170 = vmatprep.subr.bf16.mxu0 %v6142_v54  ;;  %5458 = vmatprep.subr.bf16.mxu1 %v6142_v54 }
 0x15b   :  { %4496 = vmatmul.mubr.f32.vlgmr.msra.gmra.mrb[0].mxu0 %v6162_v45  ;;  %4874 = vmatmul.mubr.f32.vlgmr.msra.gmra.mrb[0].mxu1 %v6164_v53 }
 0x15c   :  { %5172 = vmatpush3.bf16.msra.mxu0 %v6142_v54  ;;  %5460 = vmatpush3.bf16.msra.mxu1 %v6142_v54 }
 0x15d   :  { %5174 = vmatprep.subr.bf16.mxu0 %v6154_v37  ;;  %5462 = vmatprep.subr.bf16.mxu1 %v6154_v37 }
 0x15e   :  { %4516 = vmatprep.mubr.f32.mxu0 %v6110_v34  ;;  %4894 = vmatprep.mubr.f32.mxu1 %v6112_v35  ;;  %v3738_v34 = vld [vmem:[%s6366_s2] ss:$0 sm:$0xff]  ;;  %s5571_s2 = scalar_lea.vmem %s3727_s1, 512 }
 0x15f   :  { %p5572_p8 = scmp.ne.s32.totalorder %s3727_s1, %s5571_s2  ;;  %p5577_p10 = scmp.lt.s32.totalorder %s5571_s2, %s5571_s2 }
 0x160   :  { %5176 = vmatpush3.bf16.msra.mxu0 %v6154_v37  ;;  %5464 = vmatpush3.bf16.msra.mxu1 %v6154_v37 }
 0x161   :  { %5178 = vmatprep.subr.bf16.mxu0 %v6174_v55  ;;  %5466 = vmatprep.subr.bf16.mxu1 %v6174_v55  ;;  %p5578_p11 = por %p5577_p10, %p5576_p9 }
 0x163   :  { %p5579_p12 = pnand %p5578_p11, %p5572_p8 }
 0x164   :  { %5180 = vmatpush3.bf16.msra.mxu0 %v6174_v55  ;;  %5468 = vmatpush3.bf16.msra.mxu1 %v6174_v55 }
 0x165   :  { %5182 = vmatprep.subr.bf16.mxu0 %v6196_v2  ;;  %5470 = vmatprep.subr.bf16.mxu1 %v6196_v2 }
 0x168   :  { %5184 = vmatpush3.bf16.msra.mxu0 %v6196_v2  ;;  %5472 = vmatpush3.bf16.msra.mxu1 %v6196_v2 }
 0x169   :  { %4514 = vmatprep.subr.mxu0 %v6222_v52  ;;  %4892 = vmatprep.subr.mxu1 %v6222_v52 }
 0x16c   :  { %4515 = vmatpush3.msra.mxu0 %v6222_v52  ;;  %4893 = vmatpush3.msra.mxu1 %v6222_v52 }
 0x16d   :  { %4517 = vmatmul.mubr.f32.vlgmr.msra.gmra.mrb[0].mxu0 %v6162_v45  ;;  %4895 = vmatmul.mubr.f32.vlgmr.msra.gmra.mrb[0].mxu1 %v6164_v53 }
 0x240   :  { %v4518_v35 = vpop.f32.mrb[0].mxu0  ;;  %v4896_v54 = vpop.f32.mrb[0].mxu1 }
 0x241   :  { %v5473_v37 = vadd.f32 %v4518_v35, %v3738_v34  ;;  %v5475_v38 = vadd.f32 %v4896_v54, %v3738_v34  ;;  %v1863_v43 = vpop.f32.mrb[1].mxu0  ;;  %v3704_v26 = vpop.f32.mrb[1].mxu1 }
 0x242   :  { %v5474_v24 = vadd.f32 %v3738_v34, %v1863_v43  ;;  %v5476_v55 = vadd.f32 %v3738_v34, %v3704_v26 }
 0x243   :  { %v1876_v9 = vmax.f32 %v5473_v37, 0.0  ;;  %v3717_v10 = vmax.f32 %v5475_v38, 0.0 }
 0x244   :  { %v1875_v60 = vmax.f32 %v5474_v24, 0.0  ;;  %v3716_v45 = vmax.f32 %v5476_v55, 0.0 }
 0x245   :  { %1878 = vst [vmem:[#allocation5 + $0x8] sm:$0xff] %v1876_v9  ;;  %3720 = vst [vmem:[#allocation5 + $0x18] sm:$0xff] %v3717_v10 }
 0x246   :  { %1877 = vst [vmem:[#allocation5] sm:$0xff] %v1875_v60  ;;  %3719 = vst [vmem:[#allocation5 + $0x10] sm:$0xff] %v3716_v45 }
 0x247   :  { %5582 = shalt.err (!%p5579_p12)
}
 0x248   :  { %s5583_s28 = scalar_lea.hbm %s6367_s3, 512 }
 0x249   :  { %p5584_p13 = scmp.ne.s32.totalorder %s6367_s3, %s5583_s28  ;;  %p5587_p0 = scmp.lt.u32.totalorder %s5583_s28, %s6367_s3 }
 0x24b   :  { %p5589_p1 = pnand %p5587_p0, %p5584_p13 }
 0x24d   :  { %5592 = shalt.err (!%p5589_p1)
}
 0x24e   :  { %3732 = dma.vmem_to_hbm [thread:$0]  %s3727_s1, 512, %s6367_s3, [#allocation4], %s5598_s22, %s5598_s22, %s5599_s23  }
 0x24f   :  { %5595 = dma.done.wait [#allocation4], 512  }
 0x250   :  { %5596 = vsyncadd [#allocation4], 4294966784 }
 0x251   :  { %3736 = vsyncpa [#allocation3], 1 }
 0x252   :  { %3737 = vsyncpa [#allocation4], 1 }

</bundles_post_ra>
